<compile_context>
chip_gen: v6e
topology: v6e:2x2x1
jax: 0.10.0
libtpu: 0.0.40
codegen_flags: <defaults>
</compile_context>

<pallas_src>
import numpy as np
import jax
import jax.numpy as jnp
from jax.experimental import pallas as pl
from jax.experimental.pallas import tpu as pltpu


# ----------------------------------------------------------------------------
# Deterministic motion-blur kernel synthesis (replaces weights_init / _createPath)
# ----------------------------------------------------------------------------
def make_motion_blur_weight(size: int, intensity: float, channels: int, seed: int = 0):
    """Build a (channels, 1, size, size) depthwise weight, normalized to sum 1.

    # TODO(synk): PIL ImageDraw.line / ImageFilter.GaussianBlur / LANCZOS resize
    # from weights_init are approximated with a numpy rasterization + 2x2 average
    # pool; this only affects deterministic parameter init, not forward semantics.
    """
    eps_ = 1e-3
    rng = np.random.RandomState(seed)
    big = 2 * size
    diag = np.sqrt(2.0) * big

    # --- steps ---
    max_len = 0.75 * diag * (rng.uniform() + rng.uniform(0, intensity ** 2 + 1e-12))
    steps = []
    guard = 0
    while np.sum(steps) < max_len and guard < 10000:
        guard += 1
        s = rng.beta(1, 30) * (1 - intensity + eps_) * diag
        if s < max_len:
            steps.append(s)
    if not steps:
        steps = [max(max_len, 1.0)]
    steps = np.asarray(steps, dtype=np.float64)
    n = len(steps)

    # --- angles ---
    max_angle = rng.uniform(0, intensity * np.pi)
    jitter = rng.beta(2, 20)
    angles = [rng.uniform(-max_angle, max_angle)]
    while len(angles) < n:
        a = rng.triangular(0.0, intensity * max_angle, max_angle + eps_)
        prev_sign = np.sign(angles[-1]) if angles[-1] != 0 else 1.0
        if rng.uniform() < jitter:
            a *= -prev_sign
        else:
            a *= prev_sign
        angles.append(a)
    angles = np.asarray(angles, dtype=np.float64)

    # --- complex path ---
    incr = steps * np.exp(1j * angles)
    path = np.cumsum(incr)
    path = path - path.sum() / n
    path = path * np.exp(1j * rng.uniform(0, np.pi))
    path = path + (big + 1j * big) / 2.0

    # --- rasterize path onto the 2x canvas ---
    canvas = np.zeros((big, big), np.float32)
    if len(path) == 1:
        xs = int(np.clip(round(path[0].real), 0, big - 1))
        ys = int(np.clip(round(path[0].imag), 0, big - 1))
        canvas[ys, xs] = 1.0
    else:
        for p0, p1 in zip(path[:-1], path[1:]):
            npts = max(2, int(np.abs(p1 - p0) * 2) + 1)
            t = np.linspace(0.0, 1.0, npts)
            pts = p0 + t * (p1 - p0)
            xs = np.clip(np.round(pts.real).astype(int), 0, big - 1)
            ys = np.clip(np.round(pts.imag).astype(int), 0, big - 1)
            canvas[ys, xs] = 1.0

    # --- line width (dilation) ---
    width = int(diag / 150)
    if width > 1:
        dil = np.zeros_like(canvas)
        r = width // 2
        for dy in range(-r, r + 1):
            for dx in range(-r, r + 1):
                dil = np.maximum(dil, np.roll(np.roll(canvas, dy, 0), dx, 1))
        canvas = dil

    # --- gaussian blur ---
    radius = int(diag * 0.01)
    if radius > 0:
        xs = np.arange(-2 * radius, 2 * radius + 1, dtype=np.float32)
        g = np.exp(-(xs ** 2) / (2.0 * radius ** 2)).astype(np.float32)
        g /= g.sum()
        canvas = np.apply_along_axis(lambda m: np.convolve(m, g, mode="same"), 0, canvas)
        canvas = np.apply_along_axis(lambda m: np.convolve(m, g, mode="same"), 1, canvas)

    # --- downsample 2x (approx LANCZOS resize) ---
    k = canvas.reshape(size, 2, size, 2).mean(axis=(1, 3)).astype(np.float32)
    if k.sum() <= 0:
        k = np.zeros((size, size), np.float32)
        k[size // 2, size // 2] = 1.0
    k /= k.sum()

    weight = np.broadcast_to(k, (channels, 1, size, size)).astype(np.float32).copy()
    return weight


# ----------------------------------------------------------------------------
# Pallas kernel: (B, H, W) planes, W on lanes, H tiled over the grid,
# replicate-padded scratch built once per plane, strip-wise accumulation.
# ----------------------------------------------------------------------------
def _make_kernel(taps_by_col, H, W, p, T_H):
    Hp, Wp = H + 2 * p, W + 2 * p

    # Row strips of (at most) 8 sublanes: each strip's accumulator is stored
    # exactly once, bounding the live range to a handful of vregs.
    if T_H % 8 == 0:
        strips = [(s * 8, 8) for s in range(T_H // 8)]
    else:
        strips = [(0, T_H)]

    def kernel(x_ref, o_ref, xp_ref):
        # x_ref : (H, W)     VMEM — full (unpadded) plane for this b, W on lanes
        # o_ref : (T_H, W)   VMEM — output tile (rows [h*T_H, h*T_H+T_H))
        # xp_ref: (Hp, Wp)   VMEM scratch — replicate-padded plane, persists
        #                    across grid steps; rebuilt whenever h == 0.
        h = pl.program_id(1)

        @pl.when(h == 0)
        def _build_padded_plane():
            # interior (once per plane, amortized over all H tiles)
            xp_ref[p:p + H, p:p + W] = x_ref[...]
            if p > 0:
                # left / right columns (lane axis)
                left = x_ref[:, 0:1]
                right = x_ref[:, W - 1:W]
                xp_ref[p:p + H, 0:p] = jnp.broadcast_to(left, (H, p))
                xp_ref[p:p + H, p + W:Wp] = jnp.broadcast_to(right, (H, p))
                # top / bottom rows (sublane axis); read back the full-width
                # padded edge rows so the corners replicate correctly too.
                top = xp_ref[p:p + 1, :]
                bot = xp_ref[p + H - 1:p + H, :]
                xp_ref[0:p, :] = jnp.broadcast_to(top, (p, Wp))
                xp_ref[p + H:Hp, :] = jnp.broadcast_to(bot, (p, Wp))

        row0 = h * T_H  # first padded row needed by this output tile

        for (s0, sh) in strips:                      # trace-time constants
            start = row0 + s0
            if T_H % 8 == 0:
                start = pl.multiple_of(start, 8)
            acc = jnp.zeros((sh, W), jnp.float32)
            # Hoist the K column (lane-axis) shifts out of the K*K tap loop:
            # one lane-shifted load per column offset, reused for all row offsets.
            for j, col_taps in taps_by_col:
                col = xp_ref[pl.ds(start, sh + 2 * p), pl.ds(j, W)].astype(jnp.float32)
                for (i, w) in col_taps:
                    acc = acc + w * col[i:i + sh, :]
            o_ref[s0:s0 + sh, :] = acc.astype(o_ref.dtype)

    return kernel


def motion_blur_forward(x, weight_np, tile_h=None):
    """Forward pass of MotionBlur: depthwise Conv2d, stride 1, padding=K//2,
    padding_mode='replicate', groups=C, bias=False.

    x:         (N, C, H, W) float32 jax array
    weight_np: (C, 1, K, K) float32 numpy array (host-side parameter; the
               MotionBlur module copies the same kernel into every channel).
    tile_h:    optional output-tile height (must divide H; multiple of 8 or H).
    """
    N, C, H, W = x.shape
    K = int(weight_np.shape[-1])
    # PyTorch Conv2d with even K and padding=K//2 changes the output size;
    # only the odd-K case (the module default) is supported here.
    assert K % 2 == 1, "kernel_size must be odd"
    p = K // 2
    B = N * C

    k = np.asarray(weight_np, dtype=np.float32).reshape(C, K, K)
    assert all(np.array_equal(k[0], k[c]) for c in range(C)), \
        "per-channel kernels not supported"  # TODO(synk): per-channel weights would need a (K*K,) per-channel tap table
    k2d = k[0]

    # Non-zero taps grouped by column offset (trace-time constants).
    taps_by_col = []
    for j in range(K):
        col_taps = [(i, float(k2d[i, j])) for i in range(K) if k2d[i, j] != 0.0]
        if col_taps:
            taps_by_col.append((j, col_taps))

    # H tile selection: divisor of H, multiple of 8 (for sublane-aligned
    # strips / (8,128) block constraint), modest so accumulators stay small.
    if tile_h is None:
        for cand in (32, 16, 8):
            if H % cand == 0:
                tile_h = cand
                break
        else:
            tile_h = H
    assert H % tile_h == 0, "tile_h must divide H"
    assert tile_h % 8 == 0 or tile_h == H, "tile_h must be a multiple of 8 (or H)"
    n_h = H // tile_h

    Hp, Wp = H + 2 * p, W + 2 * p

    # Free layout change: NCHW viewed as (B, H, W) — W on the lane axis.
    x3 = x.reshape(B, H, W)

    # VMEM footprint: 2x input plane (double buffer) + padded scratch + 2x output tile.
    itemsize = x.dtype.itemsize
    need = (2 * H * W + Hp * Wp + 2 * tile_h * W) * itemsize
    vmem_limit = None
    if need > 24 * 1024 * 1024:
        # TODO(synk): on v7x (64 MiB physical VMEM) shrink tile_h / tile the
        # input plane in H with halos instead of raising the scoped limit.
        vmem_limit = min(int(need * 3 // 2), 96 * 1024 * 1024)

    out3 = pl.pallas_call(
        _make_kernel(taps_by_col, H, W, p, tile_h),
        out_shape=jax.ShapeDtypeStruct((B, H, W), x.dtype),
        grid=(B, n_h),
        in_specs=[
            # Full plane per b, resident & double-buffered; re-DMA only when b changes.
            pl.BlockSpec((None, H, W), lambda b, h: (b, 0, 0)),
        ],
        out_specs=pl.BlockSpec((None, tile_h, W), lambda b, h: (b, h, 0)),
        scratch_shapes=[pltpu.VMEM((Hp, Wp), x.dtype)],
        compiler_params=pltpu.CompilerParams(
            # b is independent -> "parallel" (shards across v7x's 2 TCs);
            # h must stay "arbitrary": tiles of a plane reuse the padded
            # scratch built at h == 0.
            dimension_semantics=("parallel", "arbitrary"),
            vmem_limit_bytes=vmem_limit,
        ),
    )(x3)

    return out3.reshape(N, C, H, W)


# ----------------------------------------------------------------------------
# Reference (pure JAX) for correctness check
# ----------------------------------------------------------------------------
def motion_blur_reference(x, weight):
    N, C, H, W = x.shape
    K = weight.shape[-1]
    p = K // 2
    xp = jnp.pad(x, ((0, 0), (0, 0), (p, p), (p, p)), mode="edge")
    return jax.lax.conv_general_dilated(
        xp, weight, window_strides=(1, 1), padding="VALID",
        dimension_numbers=("NCHW", "OIHW", "NCHW"),
        feature_group_count=C)


def _check(batch, channels, spatial_h, spatial_w, kernel_size, intensity, seed,
           tile_h=None):
    weight_np = make_motion_blur_weight(kernel_size, intensity, channels, seed=seed)
    key = jax.random.PRNGKey(0)
    x = jax.random.normal(key, (batch, channels, spatial_h, spatial_w),
                          dtype=jnp.float32)
    out = jax.block_until_ready(motion_blur_forward(x, weight_np, tile_h=tile_h))
    ref = jax.block_until_ready(motion_blur_reference(x, jnp.asarray(weight_np)))
    assert out.shape == (batch, channels, spatial_h, spatial_w)
    np.testing.assert_allclose(np.asarray(out), np.asarray(ref),
                               rtol=1e-5, atol=1e-5)


if __name__ == "__main__":
    # Primary (module-consistent small) shapes: MotionBlur(size=5, intensity=0, channels=4)
    _check(batch=2, channels=4, spatial_h=16, spatial_w=16,
           kernel_size=5, intensity=0.0, seed=0)
    # Non-square spatial, larger K.
    _check(batch=2, channels=16, spatial_h=32, spatial_w=48,
           kernel_size=7, intensity=0.3, seed=1)
    # Multi-tile path: forces n_h=4 H tiles (scratch reuse across h) and a
    # lane-dense W=256 (column shifts crossing 128-lane tile boundaries).
    _check(batch=1, channels=3, spatial_h=64, spatial_w=256,
           kernel_size=5, intensity=0.5, seed=2, tile_h=16)
    print("KERNEL_OK")
</pallas_src>

<mosaic_0001>
module attributes {stable_mosaic.version = 11 : i64} {
  func.func @kernel(%arg0: i32, %arg1: i32, %arg2: memref<1x16x16xf32, #tpu.memory_space<vmem>>, %arg3: memref<1x16x16xf32, #tpu.memory_space<vmem>>, %arg4: memref<20x20xf32, #tpu.memory_space<vmem>>) attributes {dimension_semantics = [#tpu.dimension_semantics<parallel>, #tpu.dimension_semantics<arbitrary>], iteration_bounds = array<i64: 8, 1>, scalar_prefetch = 0 : i64, scratch_operands = 1 : i64, tpu.core_type = #tpu.core_type<tc>, window_params = [{transform_indices = @transform_0, window_bounds = array<i64: 1, 16, 16>}, {transform_indices = @transform_1, window_bounds = array<i64: 1, 16, 16>}]} {
    %c0_i32 = arith.constant 0 : i32
    %0 = arith.cmpi eq, %arg1, %c0_i32 : i32
    %1 = arith.extui %0 : i1 to i32
    %c0_i32_0 = arith.constant 0 : i32
    %2 = arith.cmpi ne, %1, %c0_i32_0 : i32
    scf.if %2 {
      %c0_21 = arith.constant 0 : index
      %c0_22 = arith.constant 0 : index
      %c0_23 = arith.constant 0 : index
      %72 = vector.load %arg2[%c0_21, %c0_22, %c0_23] : memref<1x16x16xf32, #tpu.memory_space<vmem>>, vector<1x16x16xf32>
      %73 = vector.shape_cast %72 : vector<1x16x16xf32> to vector<16x16xf32>
      %c2_24 = arith.constant 2 : index
      %c2_25 = arith.constant 2 : index
      %74 = vector.load %arg4[%c2_24, %c2_25] : memref<20x20xf32, #tpu.memory_space<vmem>>, vector<16x16xf32>
      tpu.vector_store %arg4[%c2_24, %c2_25], %73 {strides = array<i32>} : memref<20x20xf32, #tpu.memory_space<vmem>>, vector<16x16xf32>,
      %c0_26 = arith.constant 0 : index
      %c0_27 = arith.constant 0 : index
      %c0_28 = arith.constant 0 : index
      %75 = vector.load %arg2[%c0_26, %c0_27, %c0_28] : memref<1x16x16xf32, #tpu.memory_space<vmem>>, vector<1x16x1xf32>
      %76 = vector.shape_cast %75 : vector<1x16x1xf32> to vector<16x1xf32>
      %c0_29 = arith.constant 0 : index
      %c0_30 = arith.constant 0 : index
      %c15 = arith.constant 15 : index
      %77 = vector.load %arg2[%c0_29, %c0_30, %c15] : memref<1x16x16xf32, #tpu.memory_space<vmem>>, vector<1x16x1xf32>
      %78 = vector.shape_cast %77 : vector<1x16x1xf32> to vector<16x1xf32>
      %79 = vector.shape_cast %76 : vector<16x1xf32> to vector<16x1xf32>
      %80 = vector.broadcast %79 : vector<16x1xf32> to vector<16x2xf32>
      %c2_31 = arith.constant 2 : index
      %c0_32 = arith.constant 0 : index
      %81 = vector.load %arg4[%c2_31, %c0_32] : memref<20x20xf32, #tpu.memory_space<vmem>>, vector<16x2xf32>
      tpu.vector_store %arg4[%c2_31, %c0_32], %80 {strides = array<i32>} : memref<20x20xf32, #tpu.memory_space<vmem>>, vector<16x2xf32>,
      %82 = vector.shape_cast %78 : vector<16x1xf32> to vector<16x1xf32>
      %83 = vector.broadcast %82 : vector<16x1xf32> to vector<16x2xf32>
      %c2_33 = arith.constant 2 : index
      %c18 = arith.constant 18 : index
      %84 = vector.load %arg4[%c2_33, %c18] : memref<20x20xf32, #tpu.memory_space<vmem>>, vector<16x2xf32>
      tpu.vector_store %arg4[%c2_33, %c18], %83 {strides = array<i32>} : memref<20x20xf32, #tpu.memory_space<vmem>>, vector<16x2xf32>,
      %c2_34 = arith.constant 2 : index
      %c0_35 = arith.constant 0 : index
      %85 = vector.load %arg4[%c2_34, %c0_35] : memref<20x20xf32, #tpu.memory_space<vmem>>, vector<1x20xf32>
      %c17 = arith.constant 17 : index
      %c0_36 = arith.constant 0 : index
      %86 = vector.load %arg4[%c17, %c0_36] : memref<20x20xf32, #tpu.memory_space<vmem>>, vector<1x20xf32>
      %87 = vector.shape_cast %85 : vector<1x20xf32> to vector<1x20xf32>
      %88 = vector.broadcast %87 : vector<1x20xf32> to vector<2x20xf32>
      %c0_37 = arith.constant 0 : index
      %c0_38 = arith.constant 0 : index
      %89 = vector.load %arg4[%c0_37, %c0_38] : memref<20x20xf32, #tpu.memory_space<vmem>>, vector<2x20xf32>
      tpu.vector_store %arg4[%c0_37, %c0_38], %88 {strides = array<i32>} : memref<20x20xf32, #tpu.memory_space<vmem>>, vector<2x20xf32>,
      %90 = vector.shape_cast %86 : vector<1x20xf32> to vector<1x20xf32>
      %91 = vector.broadcast %90 : vector<1x20xf32> to vector<2x20xf32>
      %c18_39 = arith.constant 18 : index
      %c0_40 = arith.constant 0 : index
      %92 = vector.load %arg4[%c18_39, %c0_40] : memref<20x20xf32, #tpu.memory_space<vmem>>, vector<2x20xf32>
      tpu.vector_store %arg4[%c18_39, %c0_40], %91 {strides = array<i32>} : memref<20x20xf32, #tpu.memory_space<vmem>>, vector<2x20xf32>,
    } else {
    }
    %c16_i32 = arith.constant 16 : i32
    %3 = arith.muli %arg1, %c16_i32 : i32
    %c0_i32_1 = arith.constant 0 : i32
    %4 = arith.addi %3, %c0_i32_1 : i32
    %5 = tpu.assume_multiple %4, 8 : i32
    %cst = arith.constant 0.000000e+00 : f32
    %6 = vector.broadcast %cst : f32 to vector<8x16xf32>
    %7 = arith.index_cast %5 : i32 to index
    %c1 = arith.constant 1 : index
    %8 = vector.load %arg4[%7, %c1] : memref<20x20xf32, #tpu.memory_space<vmem>>, vector<12x16xf32>
    %9 = vector.extract_strided_slice %8 {offsets = [3, 0], sizes = [8, 16], strides = [1, 1]} : vector<12x16xf32> to vector<8x16xf32>
    %cst_2 = arith.constant 0.142857149 : f32
    %10 = vector.broadcast %cst_2 : f32 to vector<8x16xf32>
    %11 = arith.mulf %10, %9 : vector<8x16xf32>
    %12 = arith.addf %6, %11 : vector<8x16xf32>
    %13 = arith.index_cast %5 : i32 to index
    %c2 = arith.constant 2 : index
    %14 = vector.load %arg4[%13, %c2] : memref<20x20xf32, #tpu.memory_space<vmem>>, vector<12x16xf32>
    %15 = vector.extract_strided_slice %14 {offsets = [2, 0], sizes = [8, 16], strides = [1, 1]} : vector<12x16xf32> to vector<8x16xf32>
    %cst_3 = arith.constant 0.285714298 : f32
    %16 = vector.broadcast %cst_3 : f32 to vector<8x16xf32>
    %17 = arith.mulf %16, %15 : vector<8x16xf32>
    %18 = arith.addf %12, %17 : vector<8x16xf32>
    %19 = vector.extract_strided_slice %14 {offsets = [3, 0], sizes = [8, 16], strides = [1, 1]} : vector<12x16xf32> to vector<8x16xf32>
    %cst_4 = arith.constant 0.142857149 : f32
    %20 = vector.broadcast %cst_4 : f32 to vector<8x16xf32>
    %21 = arith.mulf %20, %19 : vector<8x16xf32>
    %22 = arith.addf %18, %21 : vector<8x16xf32>
    %23 = arith.index_cast %5 : i32 to index
    %c3 = arith.constant 3 : index
    %24 = vector.load %arg4[%23, %c3] : memref<20x20xf32, #tpu.memory_space<vmem>>, vector<12x16xf32>
    %25 = vector.extract_strided_slice %24 {offsets = [2, 0], sizes = [8, 16], strides = [1, 1]} : vector<12x16xf32> to vector<8x16xf32>
    %cst_5 = arith.constant 0.285714298 : f32
    %26 = vector.broadcast %cst_5 : f32 to vector<8x16xf32>
    %27 = arith.mulf %26, %25 : vector<8x16xf32>
    %28 = arith.addf %22, %27 : vector<8x16xf32>
    %29 = arith.index_cast %5 : i32 to index
    %c4 = arith.constant 4 : index
    %30 = vector.load %arg4[%29, %c4] : memref<20x20xf32, #tpu.memory_space<vmem>>, vector<12x16xf32>
    %31 = vector.extract_strided_slice %30 {offsets = [2, 0], sizes = [8, 16], strides = [1, 1]} : vector<12x16xf32> to vector<8x16xf32>
    %cst_6 = arith.constant 0.142857149 : f32
    %32 = vector.broadcast %cst_6 : f32 to vector<8x16xf32>
    %33 = arith.mulf %32, %31 : vector<8x16xf32>
    %34 = arith.addf %28, %33 : vector<8x16xf32>
    %c0 = arith.constant 0 : index
    %c0_7 = arith.constant 0 : index
    %c0_8 = arith.constant 0 : index
    %35 = vector.load %arg3[%c0, %c0_7, %c0_8] : memref<1x16x16xf32, #tpu.memory_space<vmem>>, vector<1x8x16xf32>
    %36 = vector.shape_cast %35 : vector<1x8x16xf32> to vector<8x16xf32>
    %37 = vector.shape_cast %34 : vector<8x16xf32> to vector<1x8x16xf32>
    tpu.vector_store %arg3[%c0, %c0_7, %c0_8], %37 {strides = array<i32>} : memref<1x16x16xf32, #tpu.memory_space<vmem>>, vector<1x8x16xf32>,
    %c8_i32 = arith.constant 8 : i32
    %38 = arith.addi %3, %c8_i32 : i32
    %39 = tpu.assume_multiple %38, 8 : i32
    %cst_9 = arith.constant 0.000000e+00 : f32
    %40 = vector.broadcast %cst_9 : f32 to vector<8x16xf32>
    %41 = arith.index_cast %39 : i32 to index
    %c1_10 = arith.constant 1 : index
    %42 = vector.load %arg4[%41, %c1_10] : memref<20x20xf32, #tpu.memory_space<vmem>>, vector<12x16xf32>
    %43 = vector.extract_strided_slice %42 {offsets = [3, 0], sizes = [8, 16], strides = [1, 1]} : vector<12x16xf32> to vector<8x16xf32>
    %cst_11 = arith.constant 0.142857149 : f32
    %44 = vector.broadcast %cst_11 : f32 to vector<8x16xf32>
    %45 = arith.mulf %44, %43 : vector<8x16xf32>
    %46 = arith.addf %40, %45 : vector<8x16xf32>
    %47 = arith.index_cast %39 : i32 to index
    %c2_12 = arith.constant 2 : index
    %48 = vector.load %arg4[%47, %c2_12] : memref<20x20xf32, #tpu.memory_space<vmem>>, vector<12x16xf32>
    %49 = vector.extract_strided_slice %48 {offsets = [2, 0], sizes = [8, 16], strides = [1, 1]} : vector<12x16xf32> to vector<8x16xf32>
    %cst_13 = arith.constant 0.285714298 : f32
    %50 = vector.broadcast %cst_13 : f32 to vector<8x16xf32>
    %51 = arith.mulf %50, %49 : vector<8x16xf32>
    %52 = arith.addf %46, %51 : vector<8x16xf32>
    %53 = vector.extract_strided_slice %48 {offsets = [3, 0], sizes = [8, 16], strides = [1, 1]} : vector<12x16xf32> to vector<8x16xf32>
    %cst_14 = arith.constant 0.142857149 : f32
    %54 = vector.broadcast %cst_14 : f32 to vector<8x16xf32>
    %55 = arith.mulf %54, %53 : vector<8x16xf32>
    %56 = arith.addf %52, %55 : vector<8x16xf32>
    %57 = arith.index_cast %39 : i32 to index
    %c3_15 = arith.constant 3 : index
    %58 = vector.load %arg4[%57, %c3_15] : memref<20x20xf32, #tpu.memory_space<vmem>>, vector<12x16xf32>
    %59 = vector.extract_strided_slice %58 {offsets = [2, 0], sizes = [8, 16], strides = [1, 1]} : vector<12x16xf32> to vector<8x16xf32>
    %cst_16 = arith.constant 0.285714298 : f32
    %60 = vector.broadcast %cst_16 : f32 to vector<8x16xf32>
    %61 = arith.mulf %60, %59 : vector<8x16xf32>
    %62 = arith.addf %56, %61 : vector<8x16xf32>
    %63 = arith.index_cast %39 : i32 to index
    %c4_17 = arith.constant 4 : index
    %64 = vector.load %arg4[%63, %c4_17] : memref<20x20xf32, #tpu.memory_space<vmem>>, vector<12x16xf32>
    %65 = vector.extract_strided_slice %64 {offsets = [2, 0], sizes = [8, 16], strides = [1, 1]} : vector<12x16xf32> to vector<8x16xf32>
    %cst_18 = arith.constant 0.142857149 : f32
    %66 = vector.broadcast %cst_18 : f32 to vector<8x16xf32>
    %67 = arith.mulf %66, %65 : vector<8x16xf32>
    %68 = arith.addf %62, %67 : vector<8x16xf32>
    %c0_19 = arith.constant 0 : index
    %c8 = arith.constant 8 : index
    %c0_20 = arith.constant 0 : index
    %69 = vector.load %arg3[%c0_19, %c8, %c0_20] : memref<1x16x16xf32, #tpu.memory_space<vmem>>, vector<1x8x16xf32>
    %70 = vector.shape_cast %69 : vector<1x8x16xf32> to vector<8x16xf32>
    %71 = vector.shape_cast %68 : vector<8x16xf32> to vector<1x8x16xf32>
    tpu.vector_store %arg3[%c0_19, %c8, %c0_20], %71 {strides = array<i32>} : memref<1x16x16xf32, #tpu.memory_space<vmem>>, vector<1x8x16xf32>,
    return
  }
  func.func @transform_0(%arg0: i32, %arg1: i32) -> (i32, i32, i32) {
    %c0_i32 = arith.constant 0 : i32
    %c0_i32_0 = arith.constant 0 : i32
    %c0_i32_1 = arith.constant 0 : i32
    return %arg0, %c0_i32, %c0_i32_0 : i32, i32, i32
  }
  func.func @transform_1(%arg0: i32, %arg1: i32) -> (i32, i32, i32) {
    %c0_i32 = arith.constant 0 : i32
    %c0_i32_0 = arith.constant 0 : i32
    return %arg0, %arg1, %c0_i32 : i32, i32, i32
  }
}

</mosaic_0001>

<bundles_post_ra>
// kernel: tpu_custom_call.1
= control target key start
LH: loop header
LB: loop body
LE: loop exit
PB: predicated region body
PF: predicated region fallthrough
CT: control target
= control target key end

     0   :  { %6 = vsyncpa [#allocation4], 0  ;;  %s830_s0 = inlined_call_operand.hbm [shape: f32[8,16,16], index: 0, kind: input, shape index: {}]   ;;  %s831_s1 = inlined_call_operand.hbm [shape: f32[8,16,16], index: 1, kind: output, shape index: {}]  }
   0x1   :  { %8 = vsyncpa [#allocation4 + $0x1], 0 }
   0x2   :  { %9 = vsyncpa [#allocation5], 0 }
   0x3   :  { %11 = vsyncpa [#allocation5 + $0x1], 0  ;;  %s666_s6 = smov 0   ;;  %s668_s7 = smov 0  }
   0x4   :  { %s670_s8 = smov 0   ;;  %s672_s9 = smov 0  }
   0x5   :  { %s674_s10 = smov 0   ;;  %s676_s11 = smov 0  }
   0x6 LB: > { %s438_s12 = sadd.s32 4294967295, %s642_s11   ;;  %s439_s13 = sadd.s32 4294967294, %s642_s11   ;;  %s642_s11 = sphi %s676_s11, %s17_s11   ;;  %s638_s10 = sphi %s674_s10, %s841_s10   ;;  %s634_s9 = sphi %s672_s9, %s840_s9   ;;  %s630_s8 = sphi %s670_s8, %s839_s8   ;;  %s626_s7 = sphi %s668_s7, %s838_s7   ;;  %s622_s6 = sphi %s666_s6, %s837_s6  }
   0x7   : > { %s29_s14 = sadd.s32 1, %s638_s10  ;;  %s36_s15 = sadd.s32 1, %s630_s8 }
   0x8   : > { %p31_p0 = scmp.ge.s32.totalorder %s29_s14, 8  ;;  %p43_p1 = scmp.ne.s32.totalorder %s630_s8, %s626_s7 }
   0x9   : > { %p44_p2 = scmp.eq.s32.totalorder %s642_s11, 0  ;;  %p49_p3 = scmp.ne.s32.totalorder %s626_s7, %s622_s6 }
   0xa   : > { %s843_s14 = smov (%p31_p0, %s29_s14), 0  ;;  %p50_p5 = scmp.eq.s32.totalorder %s438_s12, 0 }
   0xb   : > { %p707_p4 = por %p44_p2, %p43_p1  ;;  %s33_s17 = ssub.s32 %s638_s10, %s843_s14 }
   0xc   : > { %p75_p6 = scmp.eq.s32.totalorder %s438_s12, 7  ;;  %p34_p7 = scmp.eq.s32.totalorder %s33_s17, 0 }
   0xd   : > { %p713_p8 = por %p50_p5, %p49_p3  ;;  %p81_p10 = scmp.eq.s32.totalorder %s439_s13, 7 }
   0xe   : > { %p717_p9 = por %p75_p6, %p43_p1  ;;  %p471_p12 = scmp.lt.s32.totalorder %s642_s11, 8 }
   0xf   : > { %s722_s20 = scalar_select %p34_p7, %s630_s8, %s36_s15  }
  0x10   : > { %p724_p11 = por %p81_p10, %p49_p3  ;;  %s101_s22 = sand.u32 1, %s630_s8  }
  0x11   : > { %s442_s23 = sshll.u32 %s101_s22, 4  ;;  %s457_s24 = sshll.u32 %s638_s10, 8 }
  0x12   : > { %s111_s27 = scalar_lea.hbm %s830_s0, %s457_s24  ;;  %s105_s28 = scalar_lea.vmem [#allocation3], %s442_s23 }
  0x13   : > { %s112_s29 = sshll.u32 %s105_s28, 4  ;;  %p736_p13 = pnand %p471_p12, %p707_p4  ;;  %s113_s29 = int_to_ptr.vmem [resolvable:$true] %s112_s29 }
  0x14   : > { %p445_p0 = scmp.ge.s32.totalorder %s642_s11, 1  ;;  %s102_s2 = scalar_lea.sflag [#allocation4], %s101_s22 }
  0x15   : > { %p536_p1 = pneg %p736_p13  ;;  %s547_s3 = scalar_lea.vmem %s113_s29, 256 }
  0x16   : > { %p548_p2 = scmp.ne.s32.totalorder %s113_s29, %s547_s3  ;;  %s644_s4 = smov [#allocation3]  }
  0x17   : > { %s552_s5 = sshll.u32 %s644_s4, 4  ;;  %s553_s5 = int_to_ptr.vmem [resolvable:$false] %s552_s5 }
  0x18   : > { %p550_p3 = pnand %p548_p2, %p536_p1  ;;  %s554_s12 = scalar_lea.vmem %s553_s5, 512 }
  0x19   : > { %p555_p6 = scmp.lt.s32.totalorder %s113_s29, %s553_s5  ;;  %p556_p7 = scmp.lt.s32.totalorder %s554_s12, %s547_s3 }
  0x1a   : > { %p551_p5 = pneg %p550_p3 }
  0x1b   : > { %p557_p10 = por %p556_p7, %p555_p6 }
  0x1d   : > { %p558_p4 = pnand %p557_p10, %p551_p5 }
  0x1f   : > { %561 = shalt.err (!%p558_p4)
}
  0x20   : > { %s645_s13 = smov 128   ;;  %s646_s15 = smov 8  }
  0x21   : > { %466 = dma.hbm_to_vmem [thread:$0]  (!%p736_p13), %s111_s27, 256, %s113_s29, %s102_s2, %s645_s13, %s645_s13, %s646_s15  }
  0x22   : > { %p120_p12 = scmp.lt.s32.totalorder %s642_s11, 9 }
  0x24   : > { %p121_p1 = pnand %p445_p0, %p120_p12 }
  0x25   : > { %s749_s16 = sand.u32 (!%p121_p1), 1, %s626_s7  }
  0x26   : > { %124 = sbr.rel (%p121_p1) target bundleno = 469 (0x1d5), region = 24  ;;  %s446_s17 = sshll.u32 (!%p121_p1), %s749_s16, 4 }
  0x27   : > { %s127_s22 = scalar_lea.sflag (!%p121_p1), [#allocation4], %s749_s16  ;;  %s130_s23 = scalar_lea.vmem (!%p121_p1), [#allocation3], %s446_s17 }
  0x2b   : > { %613 = dma.done.wait (%p713_p8), %s127_s22, 256  }
  0x2c   : > { %615 = vsyncadd (%p713_p8), %s127_s22, 4294967040  ;;  %v647_v0 = vmov 15   ;;  %v648_v1 = vmov 0   ;;  %v167_v2 = vld [vmem:[%s130_s23] sm:$0xff]  ;;  %v168_v3 = vld [vmem:[%s130_s23 + $0x8] sm:$0xff]  ;;  %s649_s24 = smov 2  }
  0x2d   : > { %532 = vset.pattern.permute.xlu1 %v647_v0  ;;  %531 = vset.pattern.permute.xlu0 %v648_v1  ;;  %vm164_vm0 = vcmask 146448   ;;  %vm179_vm1 = vcmask 15360   ;;  %vm190_vm2 = vcmask 162960   ;;  %vm199_vm3 = vcmask 156672   ;;  %s650_s18 = smov 127   ;;  %s651_s25 = smov 126  }
  0x2e   : > { %183 = vperm.xlu1 %532, %v167_v2   ;;  %171 = vperm.xlu0 %531, %v167_v2   ;;  %vm218_vm4 = vcmask 1040384   ;;  %s652_s26 = smov 125   ;;  %vm267_vm5 = vcmask 130051   ;;  %s148_s27 = scalar_lea.vmem [#allocation6], %s446_s17  ;;  %vm269_vm6 = vcmask 124928  }
  0x2f   : > { %s349_s28 = sshll.u32 %s148_s27, 4  ;;  %s458_s29 = sshll.u32 %s634_s9, 8  ;;  %s778_s28 = int_to_ptr.vmem [resolvable:$true] %s349_s28 }
  0x30   : > { %s783_s3 = scalar_lea.hbm %s831_s1, %s458_s29  ;;  %s334_s4 = scalar_lea.sflag [#allocation5], %s749_s16 }
  0x31   : > { %s562_s5 = scalar_lea.vmem %s778_s28, 256  ;;  %s653_s9 = smov [#allocation6]  }
  0x32   : > { %187 = vperm.xlu1 %532, %v168_v3   ;;  %176 = vperm.xlu0 %531, %v168_v3   ;;  %p563_p8 = scmp.ne.s32.totalorder %s778_s28, %s562_s5  ;;  %s566_s12 = sshll.u32 %s653_s9, 4  ;;  %s567_s12 = int_to_ptr.vmem [resolvable:$false] %s566_s12 }
  0x33   : > { %s568_s13 = scalar_lea.vmem %s567_s12, 512  ;;  %p569_p2 = scmp.lt.s32.totalorder %s778_s28, %s567_s12 }
  0x34   : > { %p564_p13 = pnand %p563_p8, %p717_p9  ;;  %p570_p3 = scmp.lt.s32.totalorder %s568_s13, %s562_s5 }
  0x36   : > { %160 = vrot.lane.b32.xlu1 %v168_v3, %s649_s24  ;;  %158 = vrot.lane.b32.xlu0 %v167_v2, %s649_s24  ;;  %p565_p0 = pneg %p564_p13  ;;  %p571_p5 = por %p570_p3, %p569_p2 }
  0x37   : > { %533 = vset.pattern.permute.xlu0 %v647_v0 }
  0x38   : > { %p572_p6 = pnand %p571_p5, %p565_p0 }
  0xa9   : > { %v184_v4 = vpop.permute.xlu1 %183  ;;  %v172_v5 = vpop.permute.xlu0 %171 }
  0xad   : > { %v188_v6 = vpop.permute.xlu1 %187  ;;  %v177_v7 = vpop.permute.xlu0 %176 }
  0xb1   : > { %v161_v8 = vpop.permute.xlu1 %160  ;;  %v159_v9 = vpop.permute.xlu0 %158 }
  0xb2   : > { %166 = vst.msk [vmem:[#allocation2 + $0xa] sm:$0xff] %vm164_vm0, %v161_v8  ;;  %165 = vst.msk [vmem:[#allocation2 + $0x2] sm:$0xff] %vm164_vm0, %v159_v9 }
  0xb3   : > { %181 = vst.msk [vmem:[#allocation2 + $0xa] sm:$0xff] %vm179_vm1, %v177_v7  ;;  %180 = vst.msk [vmem:[#allocation2 + $0x2] sm:$0xff] %vm179_vm1, %v172_v5 }
  0xb4   : > { %192 = vst.msk [vmem:[#allocation2 + $0xa] sm:$0xff] %vm190_vm2, %v188_v6  ;;  %191 = vst.msk [vmem:[#allocation2 + $0x2] sm:$0xff] %vm190_vm2, %v184_v4 }
  0xbb   : > { %v448_v10 = vld [vmem:[#allocation2 + $0x2] ss:$0 sm:$0xff]  ;;  %v450_v11 = vld [vmem:[#allocation2 + $0x8] sm:$0xff]  ;;  %v449_v16 = vld [vmem:[#allocation2 + $0x11] ss:$0 sm:$0xff] }
  0xbc   : > { %v209_v12 = vld [vmem:[#allocation2 + $0x8] sm:$0xf]  ;;  %v275_v13 = vmul.f32 0.14285715, %v450_v11  ;;  %200 = vst.msk [vmem:[#allocation2] sm:$0x3] %vm199_vm3, %v448_v10 }
  0xbd   : > { %v211_v14 = vmul.f32 0.14285715, %v209_v12  ;;  %v279_v15 = vmul.f32 0.2857143, %v450_v11  ;;  %205 = vst.msk [vmem:[#allocation2 + $0x12] sm:$0x3] %vm199_vm3, %v449_v16 }
  0xbe   : > { %296 = vrot.lane.b32.xlu0 %v275_v13, %s650_s18  ;;  %v215_v18 = vmul.f32 0.2857143, %v209_v12  ;;  %v312_v31 = vrot.slane %v275_v13, 7 }
  0xbf   : > { %234 = vrot.lane.b32.xlu1 %v211_v14, %s650_s18  ;;  %v283_v17 = vrot.slane %v279_v15, 7  ;;  %v249_v32 = vrot.slane %v211_v14, 7 }
  0xc0   : > { %v220_v25 = vrot.slane %v215_v18, 7 }
  0xc2   : > { %286 = vrot.lane.b32.xlu0 %v283_v17, %s650_s18 }
  0xc3   : > { %v208_v19 = vld [vmem:[#allocation2] sm:$0xff] }
  0xc4   : > { %v214_v20 = vmul.f32 0.2857143, %v208_v19  ;;  %v451_v21 = vld [vmem:[#allocation2 + $0x10] sm:$0xf]  ;;  %v210_v26 = vmul.f32 0.14285715, %v208_v19 }
  0xc5   : > { %v276_v22 = vmul.f32 0.14285715, %v451_v21  ;;  %v280_v24 = vmul.f32 0.2857143, %v451_v21 }
  0xc6   : > { %304 = vrot.lane.b32.xlu0 %v283_v17, %s651_s25  ;;  %v219_v23 = vrot.slane %v214_v20, 7  ;;  %v248_v30 = vrot.slane %v210_v26, 7 }
  0xc7   : > { %298 = vrot.lane.b32.xlu1 %v276_v22, %s650_s18  ;;  %v284_v28 = vrot.slane %v280_v24, 7  ;;  %v313_v34 = vrot.slane %v276_v22, 7 }
  0xc8   : > { %v221_v27 = vsel %vm218_vm4, %v219_v23, %v220_v25  ;;  %v250_v33 = vsel %vm218_vm4, %v248_v30, %v249_v32 }
  0xc9   : > { %v285_v29 = vsel %vm218_vm4, %v283_v17, %v284_v28  ;;  %v314_v35 = vsel %vm218_vm4, %v312_v31, %v313_v34 }
  0xca   : > { %232 = vrot.lane.b32.xlu0 %v210_v26, %s650_s18 }
  0xcb   : > { %224 = vrot.lane.b32.xlu1 %v221_v27, %s650_s18 }
  0xce   : > { %222 = vrot.lane.b32.xlu0 %v219_v23, %s650_s18 }
  0xcf   : > { %288 = vrot.lane.b32.xlu1 %v285_v29, %s650_s18 }
  0xd2   : > { %240 = vrot.lane.b32.xlu0 %v219_v23, %s651_s25 }
  0xd3   : > { %242 = vrot.lane.b32.xlu1 %v221_v27, %s651_s25 }
  0xd6   : > { %251 = vrot.lane.b32.xlu0 %v248_v30, %s652_s26 }
  0xd7   : > { %306 = vrot.lane.b32.xlu1 %v285_v29, %s651_s25 }
  0xda   : > { %315 = vrot.lane.b32.xlu0 %v312_v31, %s652_s26 }
  0xdb   : > { %253 = vrot.lane.b32.xlu1 %v250_v33, %s652_s26 }
  0xdf   : > { %317 = vrot.lane.b32.xlu1 %v314_v35, %s652_s26 }
 0x130   : > { %v297_v36 = vpop.permute.xlu0 %296 }
 0x131   : > { %v235_v38 = vpop.permute.xlu1 %234 }
 0x134   : > { %v287_v37 = vpop.permute.xlu0 %286 }
 0x135   : > { %v292_v46 = vadd.f32 %v287_v37, %v275_v13 }
 0x137   : > { %v302_v50 = vadd.f32 %v297_v36, %v292_v46 }
 0x138   : > { %v305_v39 = vpop.permute.xlu0 %304 }
 0x139   : > { %v299_v40 = vpop.permute.xlu1 %298  ;;  %v310_v56 = vadd.f32 %v305_v39, %v302_v50 }
 0x13c   : > { %v233_v41 = vpop.permute.xlu0 %232 }
 0x13d   : > { %v225_v42 = vpop.permute.xlu1 %224 }
 0x13e   : > { %v229_v51 = vadd.f32 %v225_v42, %v211_v14 }
 0x140   : > { %v223_v43 = vpop.permute.xlu0 %222  ;;  %v239_v58 = vadd.f32 %v235_v38, %v229_v51 }
 0x141   : > { %v228_v44 = vadd.f32 %v223_v43, %v210_v26  ;;  %v289_v45 = vpop.permute.xlu1 %288 }
 0x142   : > { %v293_v57 = vadd.f32 %v289_v45, %v276_v22 }
 0x143   : > { %v238_v47 = vadd.f32 %v233_v41, %v228_v44 }
 0x144   : > { %v241_v48 = vpop.permute.xlu0 %240  ;;  %v303_v63 = vadd.f32 %v299_v40, %v293_v57 }
 0x145   : > { %v243_v49 = vpop.permute.xlu1 %242  ;;  %v246_v52 = vadd.f32 %v241_v48, %v238_v47 }
 0x146   : > { %v247_v60 = vadd.f32 %v243_v49, %v239_v58 }
 0x148   : > { %v252_v53 = vpop.permute.xlu0 %251 }
 0x149   : > { %v257_v54 = vadd.f32 %v252_v53, %v246_v52  ;;  %v307_v55 = vpop.permute.xlu1 %306 }
 0x14a   : > { %v311_v1 = vadd.f32 %v307_v55, %v303_v63 }
 0x14b   : > { %261 = vrot.lane.b32.xlu0 %v257_v54, %s650_s18 }
 0x14c   : > { %v316_v59 = vpop.permute.xlu0 %315 }
 0x14d   : > { %v321_v61 = vadd.f32 %v316_v59, %v310_v56  ;;  %v254_v62 = vpop.permute.xlu1 %253 }
 0x14e   : > { %v258_v0 = vadd.f32 %v254_v62, %v247_v60 }
 0x14f   : > { %325 = vrot.lane.b32.xlu0 %v321_v61, %s650_s18 }
 0x150   : > { %263 = vrot.lane.b32.xlu1 %v258_v0, %s650_s18 }
 0x151   : > { %v318_v2 = vpop.permute.xlu1 %317 }
 0x152   : > { %v322_v3 = vadd.f32 %v318_v2, %v311_v1 }
 0x154   : > { %327 = vrot.lane.b32.xlu1 %v322_v3, %s650_s18 }
 0x1bd   : > { %v262_v4 = vpop.permute.xlu0 %261 }
 0x1be   : > { %268 = vst.msk [vmem:[%s148_s27 - $0x3] sm:$0xf8] %vm267_vm5, %v262_v4 }
 0x1c1   : > { %v326_v5 = vpop.permute.xlu0 %325 }
 0x1c2   : > { %331 = vst.msk [vmem:[%s148_s27 + $0x5] sm:$0xf8] %vm267_vm5, %v326_v5  ;;  %v264_v6 = vpop.permute.xlu1 %263 }
 0x1c3   : > { %270 = vst.msk [vmem:[%s148_s27 + $0x5] sm:$0x7] %vm269_vm6, %v264_v6 }
 0x1c6   : > { %v328_v7 = vpop.permute.xlu1 %327 }
 0x1c7   : > { %332 = vst.msk [vmem:[%s148_s27 + $0xd] sm:$0x7] %vm269_vm6, %v328_v7 }
 0x1c8   : > { %575 = shalt.err (!%p572_p6)
}
 0x1c9   : > { %s576_s15 = scalar_lea.hbm %s783_s3, 256  ;;  %s580_s23 = scalar_lea.hbm %s831_s1, 2048 }
 0x1ca   : > { %p577_p7 = scmp.ne.s32.totalorder %s783_s3, %s576_s15  ;;  %p581_p12 = scmp.lt.s32.totalorder %s783_s3, %s831_s1 }
 0x1cb   : > { %p582_p1 = scmp.lt.s32.totalorder %s580_s23, %s576_s15 }
 0x1cc   : > { %p578_p10 = pnand %p577_p7, %p717_p9 }
 0x1cd   : > { %p583_p8 = por %p582_p1, %p581_p12 }
 0x1ce   : > { %p579_p4 = pneg %p578_p10 }
 0x1d0   : > { %p584_p13 = pnand %p583_p8, %p579_p4 }
 0x1d2   : > { %587 = shalt.err (!%p584_p13)
}
 0x1d3   : > { %s654_s25 = smov 128   ;;  %s655_s26 = smov 8  }
 0x1d4   : > { %461 = dma.vmem_to_hbm [thread:$0]  (%p717_p9), %s778_s28, 256, %s783_s3, %s334_s4, %s654_s25, %s654_s25, %s655_s26  }
 0x1d5 PF: > { %p472_p0 = scmp.ge.s32.totalorder %s642_s11, 2  ;;  %s364_s27 = sand.u32 1, %s622_s6  }
 0x1d6   : > { %s365_s29 = scalar_lea.sflag [#allocation5], %s364_s27 }
 0x1d7   : > { %p468_p2 = pnand %p472_p0, %p724_p11 }
 0x1d9   : > { %p469_p3 = pneg %p468_p2 }
 0x1db   : > { %617 = dma.done.wait (%p469_p3), %s365_s29, 256  }
 0x1dc   : > { %619 = vsyncadd (%p469_p3), %s365_s29, 4294967040  ;;  %s17_s11 = sadd.s32 1, %s642_s11   ;;  %s837_s6 = smov %s626_s7 }
 0x1dd   : > { %p14_p5 = scmp.ge.s32.totalorder %s17_s11, 10   ;;  %s838_s7 = smov %s630_s8 }
 0x1de   : > { %s839_s8 = smov %s722_s20  ;;  %s840_s9 = smov %s638_s10 }
 0x1df   : > { %s841_s10 = smov %s843_s14  ;;  %16 = sbr.rel (!%p14_p5) target bundleno = 6 (0x6), region = 75 }
 0x1e4   :  { %370 = vsyncpa [#allocation4], 1 }
 0x1e5   :  { %372 = vsyncpa [#allocation4 + $0x1], 1 }
 0x1e6   :  { %373 = vsyncpa [#allocation5], 1 }
 0x1e7   :  { %375 = vsyncpa [#allocation5 + $0x1], 1 }

</bundles_post_ra>
